<compile_context>
chip_gen: v5e
topology: v5e:2x2
jax: 0.10.0
libtpu: 0.0.40
codegen_flags: <defaults>
</compile_context>

<pallas_src>
import functools

import jax
import jax.numpy as jnp
from jax.experimental import pallas as pl
from jax.experimental.pallas import tpu as pltpu


def _conv1d_kernel(x_ref, w_ref, b_ref, o_ref, xp_ref, *, cin, cout, k, l, lout_pad):
    """Valid (no padding, stride 1) 1-D convolution for one batch block.

    x_ref : (NB, C_in, L)               VMEM  natural-length input block
    w_ref : (C_out * C_in * K,)         SMEM  flattened (C_out, C_in, K) weights
    b_ref : (C_out,)                    SMEM
    o_ref : (C_out, NB, LOUT_PAD)       VMEM  batch-on-sublane, lane-dense
    xp_ref: (NB, C_in, LOUT_PAD + K-1)  VMEM  zero-padded working copy (scratch)
    """
    nb = x_ref.shape[0]

    # In-kernel zero padding of each channel row (no extra HBM pass).
    xp_ref[...] = jnp.zeros_like(xp_ref)
    xp_ref[:, :, :l] = x_ref[...].astype(jnp.float32)

    # One accumulator per output channel, seeded with its bias.
    accs = [jnp.full((nb, lout_pad), b_ref[co], dtype=jnp.float32)
            for co in range(cout)]

    # Tiny contraction (C_in * K = 9 taps): fully unrolled scalar-weight FMAs
    # on the VPU with f32 accumulation (no bf16 VPU on v5e; MXU not worth it).
    for ci in range(cin):
        for kk in range(k):
            win = xp_ref[:, ci, kk:kk + lout_pad]          # (NB, LOUT_PAD)
            for co in range(cout):
                w_scalar = w_ref[(co * cin + ci) * k + kk]
                accs[co] = accs[co] + w_scalar * win

    # Dense (NB, LOUT_PAD) tile store per output channel — no interleave.
    for co in range(cout):
        o_ref[co] = accs[co].astype(o_ref.dtype)


def conv1d_pallas(x, w, b):
    """x: (N, C_in, L) f32, w: (C_out, C_in, K) f32, b: (C_out,) f32.

    Returns Conv1d(x, w, b) with VALID padding, stride 1: (N, C_out, L - K + 1).
    """
    n, cin, l = x.shape
    cout, cin_w, k = w.shape
    assert cin_w == cin
    lout = l - k + 1
    assert lout > 0, "input length must be >= kernel size"

    # Lane-dense output width, derived from L_out (not L).
    lout_pad = pl.cdiv(lout, 128) * 128
    l_work = lout_pad + k - 1            # padded working width (>= L)

    # Batch block: fill the sublane axis (up to 8 batch rows per grid step).
    nb = n if n <= 8 else 8
    n_pad = nb * pl.cdiv(n, nb)
    if n_pad != n:
        # Small batch-axis pad only when N > 8 and not a multiple of 8.
        x = jnp.pad(x, ((0, n_pad - n), (0, 0), (0, 0)))

    kernel = functools.partial(
        _conv1d_kernel, cin=cin, cout=cout, k=k, l=l, lout_pad=lout_pad)

    out_int = pl.pallas_call(
        kernel,
        out_shape=jax.ShapeDtypeStruct((cout, n_pad, lout_pad), x.dtype),
        grid=(n_pad // nb,),
        in_specs=[
            # NB batch rows per grid step; full channel & natural length.
            pl.BlockSpec((nb, cin, l), lambda i: (i, 0, 0)),
            # Small parameter tables live in SMEM (scalar reads per tap).
            pl.BlockSpec((cout * cin * k,), lambda i: (0,),
                         memory_space=pltpu.MemorySpace.SMEM),
            pl.BlockSpec((cout,), lambda i: (0,),
                         memory_space=pltpu.MemorySpace.SMEM),
        ],
        # Batch-on-sublane, lane-dense internal output layout.
        out_specs=pl.BlockSpec((cout, nb, lout_pad), lambda i: (0, i, 0)),
        scratch_shapes=[pltpu.VMEM((nb, cin, l_work), jnp.float32)],
        compiler_params=pltpu.CompilerParams(
            dimension_semantics=("parallel",),   # batch axis -> megacore on v7x
        ),
    )(x, w.reshape(-1), b)

    # (C_out, N_pad, LOUT_PAD) -> (N, C_out, L_out): one fused slice+transpose.
    return jnp.transpose(out_int[:, :n, :lout], (1, 0, 2))


class ModelPallas:
    """JAX/Pallas equivalent of the PyTorch Model (only conv1 is observable)."""

    def __init__(self, key):
        cin, cout, k = 3, 3, 3
        k1, k2 = jax.random.split(key)
        bound = 1.0 / jnp.sqrt(cin * k)  # PyTorch Conv1d default init bound
        self.w1 = jax.random.uniform(k1, (cout, cin, k), jnp.float32, -bound, bound)
        self.b1 = jax.random.uniform(k2, (cout,), jnp.float32, -bound, bound)
        # conv2 / bn parameters exist in the PyTorch module but never affect
        # the returned value -> omitted from the compute path.

    def __call__(self, x):
        return conv1d_pallas(x, self.w1, self.b1)


def _conv1d_ref(x, w, b):
    """Plain-JAX reference (NCW conv, VALID padding) for verification."""
    out = jax.lax.conv_general_dilated(
        x, w, window_strides=(1,), padding="VALID",
        dimension_numbers=("NCH", "OIH", "NCH"),
    )
    return out + b[None, :, None]


if __name__ == "__main__":
    key = jax.random.PRNGKey(0)
    k_model, k_x = jax.random.split(key)

    model = ModelPallas(k_model)

    # Small input consistent with Conv1d(3, 3, 3): N=2, C=3, L=16.
    x = jax.random.normal(k_x, (2, 3, 16), dtype=jnp.float32)

    s = jax.block_until_ready(model(x))

    s_ref = _conv1d_ref(x, model.w1, model.b1)
    assert s.shape == (2, 3, 14), s.shape
    assert jnp.allclose(s, s_ref, atol=1e-5, rtol=1e-5), "mismatch vs reference"

    print("KERNEL_OK")
</pallas_src>

<mosaic_0001>
module attributes {stable_mosaic.version = 11 : i64} {
  func.func @_conv1d_kernel(%arg0: i32, %arg1: memref<2x3x16xf32, #tpu.memory_space<vmem>>, %arg2: memref<27xf32, #tpu.memory_space<smem>>, %arg3: memref<3xf32, #tpu.memory_space<smem>>, %arg4: memref<3x2x128xf32, #tpu.memory_space<vmem>>, %arg5: memref<2x3x130xf32, #tpu.memory_space<vmem>>) attributes {dimension_semantics = [#tpu.dimension_semantics<parallel>], iteration_bounds = array<i64: 1>, scalar_prefetch = 0 : i64, scratch_operands = 1 : i64, tpu.core_type = #tpu.core_type<tc>, window_params = [{transform_indices = @transform_0, window_bounds = array<i64: 2, 3, 16>}, {transform_indices = @transform_1, window_bounds = array<i64: 27>}, {transform_indices = @transform_2, window_bounds = array<i64: 3>}, {transform_indices = @transform_3, window_bounds = array<i64: 3, 2, 128>}]} {
    %cst = arith.constant 0.000000e+00 : f32
    %0 = vector.broadcast %cst : f32 to vector<2x3x130xf32>
    %c0 = arith.constant 0 : index
    %c0_0 = arith.constant 0 : index
    %c0_1 = arith.constant 0 : index
    %1 = vector.load %arg5[%c0, %c0_0, %c0_1] : memref<2x3x130xf32, #tpu.memory_space<vmem>>, vector<2x3x130xf32>
    tpu.vector_store %arg5[%c0, %c0_0, %c0_1], %0 {strides = array<i32>} : memref<2x3x130xf32, #tpu.memory_space<vmem>>, vector<2x3x130xf32>,
    %c0_2 = arith.constant 0 : index
    %c0_3 = arith.constant 0 : index
    %c0_4 = arith.constant 0 : index
    %2 = vector.load %arg1[%c0_2, %c0_3, %c0_4] : memref<2x3x16xf32, #tpu.memory_space<vmem>>, vector<2x3x16xf32>
    %c0_5 = arith.constant 0 : index
    %c0_6 = arith.constant 0 : index
    %c0_7 = arith.constant 0 : index
    %3 = vector.load %arg5[%c0_5, %c0_6, %c0_7] : memref<2x3x130xf32, #tpu.memory_space<vmem>>, vector<2x3x16xf32>
    tpu.vector_store %arg5[%c0_5, %c0_6, %c0_7], %2 {strides = array<i32>} : memref<2x3x130xf32, #tpu.memory_space<vmem>>, vector<2x3x16xf32>,
    %c0_8 = arith.constant 0 : index
    %4 = memref.load %arg3[%c0_8] : memref<3xf32, #tpu.memory_space<smem>>
    %5 = vector.broadcast %4 : f32 to vector<2x128xf32>
    %c1 = arith.constant 1 : index
    %6 = memref.load %arg3[%c1] : memref<3xf32, #tpu.memory_space<smem>>
    %7 = vector.broadcast %6 : f32 to vector<2x128xf32>
    %c2 = arith.constant 2 : index
    %8 = memref.load %arg3[%c2] : memref<3xf32, #tpu.memory_space<smem>>
    %9 = vector.broadcast %8 : f32 to vector<2x128xf32>
    %c0_9 = arith.constant 0 : index
    %c0_10 = arith.constant 0 : index
    %c0_11 = arith.constant 0 : index
    %10 = vector.load %arg5[%c0_9, %c0_10, %c0_11] : memref<2x3x130xf32, #tpu.memory_space<vmem>>, vector<2x1x128xf32>
    %11 = vector.shape_cast %10 : vector<2x1x128xf32> to vector<2x128xf32>
    %c0_12 = arith.constant 0 : index
    %12 = memref.load %arg2[%c0_12] : memref<27xf32, #tpu.memory_space<smem>>
    %13 = vector.broadcast %12 : f32 to vector<2x128xf32>
    %14 = arith.mulf %13, %11 : vector<2x128xf32>
    %15 = arith.addf %5, %14 : vector<2x128xf32>
    %c9 = arith.constant 9 : index
    %16 = memref.load %arg2[%c9] : memref<27xf32, #tpu.memory_space<smem>>
    %17 = vector.broadcast %16 : f32 to vector<2x128xf32>
    %18 = arith.mulf %17, %11 : vector<2x128xf32>
    %19 = arith.addf %7, %18 : vector<2x128xf32>
    %c18 = arith.constant 18 : index
    %20 = memref.load %arg2[%c18] : memref<27xf32, #tpu.memory_space<smem>>
    %21 = vector.broadcast %20 : f32 to vector<2x128xf32>
    %22 = arith.mulf %21, %11 : vector<2x128xf32>
    %23 = arith.addf %9, %22 : vector<2x128xf32>
    %c0_13 = arith.constant 0 : index
    %c0_14 = arith.constant 0 : index
    %c1_15 = arith.constant 1 : index
    %24 = vector.load %arg5[%c0_13, %c0_14, %c1_15] : memref<2x3x130xf32, #tpu.memory_space<vmem>>, vector<2x1x128xf32>
    %25 = vector.shape_cast %24 : vector<2x1x128xf32> to vector<2x128xf32>
    %c1_16 = arith.constant 1 : index
    %26 = memref.load %arg2[%c1_16] : memref<27xf32, #tpu.memory_space<smem>>
    %27 = vector.broadcast %26 : f32 to vector<2x128xf32>
    %28 = arith.mulf %27, %25 : vector<2x128xf32>
    %29 = arith.addf %15, %28 : vector<2x128xf32>
    %c10 = arith.constant 10 : index
    %30 = memref.load %arg2[%c10] : memref<27xf32, #tpu.memory_space<smem>>
    %31 = vector.broadcast %30 : f32 to vector<2x128xf32>
    %32 = arith.mulf %31, %25 : vector<2x128xf32>
    %33 = arith.addf %19, %32 : vector<2x128xf32>
    %c19 = arith.constant 19 : index
    %34 = memref.load %arg2[%c19] : memref<27xf32, #tpu.memory_space<smem>>
    %35 = vector.broadcast %34 : f32 to vector<2x128xf32>
    %36 = arith.mulf %35, %25 : vector<2x128xf32>
    %37 = arith.addf %23, %36 : vector<2x128xf32>
    %c0_17 = arith.constant 0 : index
    %c0_18 = arith.constant 0 : index
    %c2_19 = arith.constant 2 : index
    %38 = vector.load %arg5[%c0_17, %c0_18, %c2_19] : memref<2x3x130xf32, #tpu.memory_space<vmem>>, vector<2x1x128xf32>
    %39 = vector.shape_cast %38 : vector<2x1x128xf32> to vector<2x128xf32>
    %c2_20 = arith.constant 2 : index
    %40 = memref.load %arg2[%c2_20] : memref<27xf32, #tpu.memory_space<smem>>
    %41 = vector.broadcast %40 : f32 to vector<2x128xf32>
    %42 = arith.mulf %41, %39 : vector<2x128xf32>
    %43 = arith.addf %29, %42 : vector<2x128xf32>
    %c11 = arith.constant 11 : index
    %44 = memref.load %arg2[%c11] : memref<27xf32, #tpu.memory_space<smem>>
    %45 = vector.broadcast %44 : f32 to vector<2x128xf32>
    %46 = arith.mulf %45, %39 : vector<2x128xf32>
    %47 = arith.addf %33, %46 : vector<2x128xf32>
    %c20 = arith.constant 20 : index
    %48 = memref.load %arg2[%c20] : memref<27xf32, #tpu.memory_space<smem>>
    %49 = vector.broadcast %48 : f32 to vector<2x128xf32>
    %50 = arith.mulf %49, %39 : vector<2x128xf32>
    %51 = arith.addf %37, %50 : vector<2x128xf32>
    %c0_21 = arith.constant 0 : index
    %c1_22 = arith.constant 1 : index
    %c0_23 = arith.constant 0 : index
    %52 = vector.load %arg5[%c0_21, %c1_22, %c0_23] : memref<2x3x130xf32, #tpu.memory_space<vmem>>, vector<2x1x128xf32>
    %53 = vector.shape_cast %52 : vector<2x1x128xf32> to vector<2x128xf32>
    %c3 = arith.constant 3 : index
    %54 = memref.load %arg2[%c3] : memref<27xf32, #tpu.memory_space<smem>>
    %55 = vector.broadcast %54 : f32 to vector<2x128xf32>
    %56 = arith.mulf %55, %53 : vector<2x128xf32>
    %57 = arith.addf %43, %56 : vector<2x128xf32>
    %c12 = arith.constant 12 : index
    %58 = memref.load %arg2[%c12] : memref<27xf32, #tpu.memory_space<smem>>
    %59 = vector.broadcast %58 : f32 to vector<2x128xf32>
    %60 = arith.mulf %59, %53 : vector<2x128xf32>
    %61 = arith.addf %47, %60 : vector<2x128xf32>
    %c21 = arith.constant 21 : index
    %62 = memref.load %arg2[%c21] : memref<27xf32, #tpu.memory_space<smem>>
    %63 = vector.broadcast %62 : f32 to vector<2x128xf32>
    %64 = arith.mulf %63, %53 : vector<2x128xf32>
    %65 = arith.addf %51, %64 : vector<2x128xf32>
    %c0_24 = arith.constant 0 : index
    %c1_25 = arith.constant 1 : index
    %c1_26 = arith.constant 1 : index
    %66 = vector.load %arg5[%c0_24, %c1_25, %c1_26] : memref<2x3x130xf32, #tpu.memory_space<vmem>>, vector<2x1x128xf32>
    %67 = vector.shape_cast %66 : vector<2x1x128xf32> to vector<2x128xf32>
    %c4 = arith.constant 4 : index
    %68 = memref.load %arg2[%c4] : memref<27xf32, #tpu.memory_space<smem>>
    %69 = vector.broadcast %68 : f32 to vector<2x128xf32>
    %70 = arith.mulf %69, %67 : vector<2x128xf32>
    %71 = arith.addf %57, %70 : vector<2x128xf32>
    %c13 = arith.constant 13 : index
    %72 = memref.load %arg2[%c13] : memref<27xf32, #tpu.memory_space<smem>>
    %73 = vector.broadcast %72 : f32 to vector<2x128xf32>
    %74 = arith.mulf %73, %67 : vector<2x128xf32>
    %75 = arith.addf %61, %74 : vector<2x128xf32>
    %c22 = arith.constant 22 : index
    %76 = memref.load %arg2[%c22] : memref<27xf32, #tpu.memory_space<smem>>
    %77 = vector.broadcast %76 : f32 to vector<2x128xf32>
    %78 = arith.mulf %77, %67 : vector<2x128xf32>
    %79 = arith.addf %65, %78 : vector<2x128xf32>
    %c0_27 = arith.constant 0 : index
    %c1_28 = arith.constant 1 : index
    %c2_29 = arith.constant 2 : index
    %80 = vector.load %arg5[%c0_27, %c1_28, %c2_29] : memref<2x3x130xf32, #tpu.memory_space<vmem>>, vector<2x1x128xf32>
    %81 = vector.shape_cast %80 : vector<2x1x128xf32> to vector<2x128xf32>
    %c5 = arith.constant 5 : index
    %82 = memref.load %arg2[%c5] : memref<27xf32, #tpu.memory_space<smem>>
    %83 = vector.broadcast %82 : f32 to vector<2x128xf32>
    %84 = arith.mulf %83, %81 : vector<2x128xf32>
    %85 = arith.addf %71, %84 : vector<2x128xf32>
    %c14 = arith.constant 14 : index
    %86 = memref.load %arg2[%c14] : memref<27xf32, #tpu.memory_space<smem>>
    %87 = vector.broadcast %86 : f32 to vector<2x128xf32>
    %88 = arith.mulf %87, %81 : vector<2x128xf32>
    %89 = arith.addf %75, %88 : vector<2x128xf32>
    %c23 = arith.constant 23 : index
    %90 = memref.load %arg2[%c23] : memref<27xf32, #tpu.memory_space<smem>>
    %91 = vector.broadcast %90 : f32 to vector<2x128xf32>
    %92 = arith.mulf %91, %81 : vector<2x128xf32>
    %93 = arith.addf %79, %92 : vector<2x128xf32>
    %c0_30 = arith.constant 0 : index
    %c2_31 = arith.constant 2 : index
    %c0_32 = arith.constant 0 : index
    %94 = vector.load %arg5[%c0_30, %c2_31, %c0_32] : memref<2x3x130xf32, #tpu.memory_space<vmem>>, vector<2x1x128xf32>
    %95 = vector.shape_cast %94 : vector<2x1x128xf32> to vector<2x128xf32>
    %c6 = arith.constant 6 : index
    %96 = memref.load %arg2[%c6] : memref<27xf32, #tpu.memory_space<smem>>
    %97 = vector.broadcast %96 : f32 to vector<2x128xf32>
    %98 = arith.mulf %97, %95 : vector<2x128xf32>
    %99 = arith.addf %85, %98 : vector<2x128xf32>
    %c15 = arith.constant 15 : index
    %100 = memref.load %arg2[%c15] : memref<27xf32, #tpu.memory_space<smem>>
    %101 = vector.broadcast %100 : f32 to vector<2x128xf32>
    %102 = arith.mulf %101, %95 : vector<2x128xf32>
    %103 = arith.addf %89, %102 : vector<2x128xf32>
    %c24 = arith.constant 24 : index
    %104 = memref.load %arg2[%c24] : memref<27xf32, #tpu.memory_space<smem>>
    %105 = vector.broadcast %104 : f32 to vector<2x128xf32>
    %106 = arith.mulf %105, %95 : vector<2x128xf32>
    %107 = arith.addf %93, %106 : vector<2x128xf32>
    %c0_33 = arith.constant 0 : index
    %c2_34 = arith.constant 2 : index
    %c1_35 = arith.constant 1 : index
    %108 = vector.load %arg5[%c0_33, %c2_34, %c1_35] : memref<2x3x130xf32, #tpu.memory_space<vmem>>, vector<2x1x128xf32>
    %109 = vector.shape_cast %108 : vector<2x1x128xf32> to vector<2x128xf32>
    %c7 = arith.constant 7 : index
    %110 = memref.load %arg2[%c7] : memref<27xf32, #tpu.memory_space<smem>>
    %111 = vector.broadcast %110 : f32 to vector<2x128xf32>
    %112 = arith.mulf %111, %109 : vector<2x128xf32>
    %113 = arith.addf %99, %112 : vector<2x128xf32>
    %c16 = arith.constant 16 : index
    %114 = memref.load %arg2[%c16] : memref<27xf32, #tpu.memory_space<smem>>
    %115 = vector.broadcast %114 : f32 to vector<2x128xf32>
    %116 = arith.mulf %115, %109 : vector<2x128xf32>
    %117 = arith.addf %103, %116 : vector<2x128xf32>
    %c25 = arith.constant 25 : index
    %118 = memref.load %arg2[%c25] : memref<27xf32, #tpu.memory_space<smem>>
    %119 = vector.broadcast %118 : f32 to vector<2x128xf32>
    %120 = arith.mulf %119, %109 : vector<2x128xf32>
    %121 = arith.addf %107, %120 : vector<2x128xf32>
    %c0_36 = arith.constant 0 : index
    %c2_37 = arith.constant 2 : index
    %c2_38 = arith.constant 2 : index
    %122 = vector.load %arg5[%c0_36, %c2_37, %c2_38] : memref<2x3x130xf32, #tpu.memory_space<vmem>>, vector<2x1x128xf32>
    %123 = vector.shape_cast %122 : vector<2x1x128xf32> to vector<2x128xf32>
    %c8 = arith.constant 8 : index
    %124 = memref.load %arg2[%c8] : memref<27xf32, #tpu.memory_space<smem>>
    %125 = vector.broadcast %124 : f32 to vector<2x128xf32>
    %126 = arith.mulf %125, %123 : vector<2x128xf32>
    %127 = arith.addf %113, %126 : vector<2x128xf32>
    %c17 = arith.constant 17 : index
    %128 = memref.load %arg2[%c17] : memref<27xf32, #tpu.memory_space<smem>>
    %129 = vector.broadcast %128 : f32 to vector<2x128xf32>
    %130 = arith.mulf %129, %123 : vector<2x128xf32>
    %131 = arith.addf %117, %130 : vector<2x128xf32>
    %c26 = arith.constant 26 : index
    %132 = memref.load %arg2[%c26] : memref<27xf32, #tpu.memory_space<smem>>
    %133 = vector.broadcast %132 : f32 to vector<2x128xf32>
    %134 = arith.mulf %133, %123 : vector<2x128xf32>
    %135 = arith.addf %121, %134 : vector<2x128xf32>
    %c0_39 = arith.constant 0 : index
    %c0_40 = arith.constant 0 : index
    %c0_41 = arith.constant 0 : index
    %136 = vector.load %arg4[%c0_39, %c0_40, %c0_41] : memref<3x2x128xf32, #tpu.memory_space<vmem>>, vector<1x2x128xf32>
    %137 = vector.shape_cast %136 : vector<1x2x128xf32> to vector<2x128xf32>
    %138 = vector.shape_cast %127 : vector<2x128xf32> to vector<1x2x128xf32>
    tpu.vector_store %arg4[%c0_39, %c0_40, %c0_41], %138 {strides = array<i32>} : memref<3x2x128xf32, #tpu.memory_space<vmem>>, vector<1x2x128xf32>,
    %c1_42 = arith.constant 1 : index
    %c0_43 = arith.constant 0 : index
    %c0_44 = arith.constant 0 : index
    %139 = vector.load %arg4[%c1_42, %c0_43, %c0_44] : memref<3x2x128xf32, #tpu.memory_space<vmem>>, vector<1x2x128xf32>
    %140 = vector.shape_cast %139 : vector<1x2x128xf32> to vector<2x128xf32>
    %141 = vector.shape_cast %131 : vector<2x128xf32> to vector<1x2x128xf32>
    tpu.vector_store %arg4[%c1_42, %c0_43, %c0_44], %141 {strides = array<i32>} : memref<3x2x128xf32, #tpu.memory_space<vmem>>, vector<1x2x128xf32>,
    %c2_45 = arith.constant 2 : index
    %c0_46 = arith.constant 0 : index
    %c0_47 = arith.constant 0 : index
    %142 = vector.load %arg4[%c2_45, %c0_46, %c0_47] : memref<3x2x128xf32, #tpu.memory_space<vmem>>, vector<1x2x128xf32>
    %143 = vector.shape_cast %142 : vector<1x2x128xf32> to vector<2x128xf32>
    %144 = vector.shape_cast %135 : vector<2x128xf32> to vector<1x2x128xf32>
    tpu.vector_store %arg4[%c2_45, %c0_46, %c0_47], %144 {strides = array<i32>} : memref<3x2x128xf32, #tpu.memory_space<vmem>>, vector<1x2x128xf32>,
    return
  }
  func.func @transform_0(%arg0: i32) -> (i32, i32, i32) {
    %c0_i32 = arith.constant 0 : i32
    %c0_i32_0 = arith.constant 0 : i32
    %c0_i32_1 = arith.constant 0 : i32
    return %arg0, %c0_i32, %c0_i32_0 : i32, i32, i32
  }
  func.func @transform_1(%arg0: i32) -> i32 {
    %c0_i32 = arith.constant 0 : i32
    %c0_i32_0 = arith.constant 0 : i32
    return %c0_i32 : i32
  }
  func.func @transform_2(%arg0: i32) -> i32 {
    %c0_i32 = arith.constant 0 : i32
    %c0_i32_0 = arith.constant 0 : i32
    return %c0_i32 : i32
  }
  func.func @transform_3(%arg0: i32) -> (i32, i32, i32) {
    %c0_i32 = arith.constant 0 : i32
    %c0_i32_0 = arith.constant 0 : i32
    %c0_i32_1 = arith.constant 0 : i32
    return %c0_i32, %arg0, %c0_i32_0 : i32, i32, i32
  }
}

</mosaic_0001>

<bundles_post_ra>
// kernel: tpu_custom_call.1
= control target key start
LH: loop header
LB: loop body
LE: loop exit
PB: predicated region body
PF: predicated region fallthrough
CT: control target
= control target key end

     0   :  { %8 = vsyncpa [#allocation5], 0  ;;  %s869_s0 = inlined_call_operand.vmem [shape: f32[2,3,16], index: 0, kind: input, shape index: {}]   ;;  %s870_s1 = inlined_call_operand.vmem [shape: f32[27], index: 1, kind: input, shape index: {}]   ;;  %s871_s2 = inlined_call_operand.vmem [shape: f32[3], index: 2, kind: input, shape index: {}]   ;;  %s872_s3 = inlined_call_operand.hbm [shape: f32[3,2,128], index: 3, kind: output, shape index: {}]  }
   0x1   :  { %9 = vsyncpa [#allocation7], 0 }
   0x2   :  { %10 = vsyncpa [#allocation4], 0  ;;  %s18_s14 = sshll.u32 %s870_s1, 4  ;;  %s27_s17 = sshll.u32 %s871_s2, 4  ;;  %s19_s14 = int_to_ptr.vmem [resolvable:$true] %s18_s14  ;;  %s28_s17 = int_to_ptr.vmem [resolvable:$true] %s27_s17 }
   0x3   :  { %s582_s18 = smov [#allocation3]   ;;  %s583_s19 = smov [#allocation6]  }
   0x4   :  { %21 = dma.vmem_to_smem %s19_s14, 16, %s582_s18, [#allocation5]  }
   0x5   :  { %30 = dma.vmem_to_smem %s28_s17, 16, %s583_s19, [#allocation7]  }
   0x6   :  { %576 = dma.done.wait [#allocation5], 16  }
   0x7   :  { %577 = vsyncadd [#allocation5], 4294967280 }
   0x8   :  { %578 = dma.done.wait [#allocation7], 16  }
   0x9   :  { %579 = vsyncadd [#allocation7], 4294967280 }
   0xa   :  { %39 = sfence }
   0xb   :  { %vm40_vm0 = vcmask 1042432   ;;  %vm41_vm1 = vcmask 14340   ;;  %v45_v0 = vld [vmem:[%s869_s0] sm:$0x7]  ;;  %vm47_vm3 = vcmask 124928   ;;  %s498_s21 = sld [smem:[#allocation3 + $0x13]] }
   0xc   :  { %vm42_vm2 = vmor %vm41_vm1, %vm40_vm0  ;;  %v584_v1 = vmov 0.0   ;;  %v46_v2 = vld [vmem:[%s869_s0 + $0x4] sm:$0x7]  ;;  %s497_s23 = sld [smem:[#allocation3 + $0xa]]  ;;  %s585_s25 = smov 127   ;;  %vm90_vm4 = vcmask 1039360  }
   0xd   :  { %43 = vst.msk [vmem:[#allocation2] sm:$0x77] %vm42_vm2, %v584_v1  ;;  %s496_s24 = sld [smem:[#allocation3 + $0x1]]  ;;  %s586_s28 = smov 126   ;;  %vm145_vm5 = vcmask 1031168   ;;  %vm452_vm6 = vcmask 1041409  }
   0xe   :  { %44 = vst.msk [vmem:[#allocation2 + $0x8] sm:$0x77] %vm42_vm2, %v584_v1  ;;  %s500_s26 = sld [smem:[#allocation3 + $0xb]] }
   0xf   :  { %48 = vst.msk [vmem:[#allocation2] sm:$0x7] %vm47_vm3, %v45_v0  ;;  %s499_s0 = sld [smem:[#allocation3 + $0x2]] }
  0x10   :  { %49 = vst.msk [vmem:[#allocation2 + $0x8] sm:$0x7] %vm47_vm3, %v46_v2  ;;  %s501_s27 = sld [smem:[#allocation3 + $0x14]] }
  0x11   :  { %v116_v3 = vstv %s498_s21  ;;  %s506_s29 = sld [smem:[#allocation3 + $0xd]] }
  0x12   :  { %v98_v4 = vstv %s497_s23  ;;  %s505_s30 = sld [smem:[#allocation3 + $0x4]] }
  0x13   :  { %v79_v5 = vstv %s496_s24  ;;  %s507_s4 = sld [smem:[#allocation3 + $0x16]]  ;;  %s587_s24 = smov [#allocation8]  }
  0x14   :  { %v153_v14 = vstv %s500_s26  ;;  %s509_s5 = sld [smem:[#allocation3 + $0xe]] }
  0x15   :  { %v134_v15 = vstv %s499_s0  ;;  %s508_s6 = sld [smem:[#allocation3 + $0x5]] }
  0x16   :  { %v76_v6 = vld [vmem:[#allocation2] sm:$0x11]  ;;  %v171_v19 = vstv %s501_s27  ;;  %v208_v23 = vld [vmem:[#allocation2 + $0x1] sm:$0x11]  ;;  %s510_s7 = sld [smem:[#allocation3 + $0x17]]  ;;  %s478_s27 = sshll.u32 %s872_s3, 4  ;;  %s479_s27 = int_to_ptr.hbm [resolvable:$true] %s478_s27 }
  0x17   :  { %v117_v7 = vmul.f32 %v116_v3, %v76_v6  ;;  %v99_v8 = vmul.f32 %v98_v4, %v76_v6  ;;  %v80_v9 = vmul.f32 %v79_v5, %v76_v6  ;;  %v77_v10 = vld [vmem:[#allocation2 + $0x8] sm:$0x11]  ;;  %v154_v16 = vmul.f32 %v153_v14, %v76_v6  ;;  %v209_v25 = vld [vmem:[#allocation2 + $0x9] sm:$0x11]  ;;  %s515_s8 = sld [smem:[#allocation3 + $0x10]] }
  0x18   :  { %v118_v11 = vmul.f32 %v116_v3, %v77_v10  ;;  %v100_v12 = vmul.f32 %v98_v4, %v77_v10  ;;  %v81_v13 = vmul.f32 %v79_v5, %v77_v10  ;;  %v136_v17 = vmul.f32 %v134_v15, %v77_v10  ;;  %s514_s9 = sld [smem:[#allocation3 + $0x7]]  ;;  %v338_v43 = vld [vmem:[#allocation2 + $0x2] sm:$0x11]  ;;  %v339_v45 = vld [vmem:[#allocation2 + $0xa] sm:$0x11] }
  0x19   :  { %121 = vrot.lane.b32.xlu2 %v117_v7, %s585_s25  ;;  %103 = vrot.lane.b32.xlu1 %v99_v8, %s585_s25  ;;  %v135_v18 = vmul.f32 %v134_v15, %v76_v6  ;;  %v173_v20 = vmul.f32 %v171_v19, %v77_v10  ;;  %v172_v21 = vmul.f32 %v171_v19, %v76_v6  ;;  %v229_v24 = vstv %s506_s29  ;;  %s516_s10 = sld [smem:[#allocation3 + $0x19]]  ;;  %s589_s29 = smov 2  }
  0x1a   :  { %84 = vrot.lane.b32.xlu0 %v80_v9, %s585_s25  ;;  %v155_v22 = vmul.f32 %v153_v14, %v77_v10  ;;  %v211_v26 = vstv %s505_s30  ;;  %v230_v27 = vmul.f32 %v229_v24, %v208_v23  ;;  %v247_v30 = vstv %s507_s4  ;;  %s518_s11 = sld [smem:[#allocation3 + $0x11]] }
  0x1b   :  { %v213_v28 = vmul.f32 %v211_v26, %v209_v25  ;;  %v212_v29 = vmul.f32 %v211_v26, %v208_v23  ;;  %v249_v31 = vmul.f32 %v247_v30, %v209_v25  ;;  %v248_v32 = vmul.f32 %v247_v30, %v208_v23  ;;  %s517_s12 = sld [smem:[#allocation3 + $0x8]] }
  0x1c   :  { %v231_v33 = vmul.f32 %v229_v24, %v209_v25  ;;  %v283_v34 = vstv %s509_s5  ;;  %v265_v35 = vstv %s508_s6  ;;  %v301_v39 = vstv %s510_s7  ;;  %s519_s13 = sld [smem:[#allocation3 + $0x1a]] }
  0x1d   :  { %v284_v36 = vmul.f32 %v283_v34, %v208_v23  ;;  %v267_v37 = vmul.f32 %v265_v35, %v209_v25  ;;  %v266_v38 = vmul.f32 %v265_v35, %v208_v23  ;;  %v303_v40 = vmul.f32 %v301_v39, %v209_v25  ;;  %s495_s14 = sld [smem:[#allocation3 + $0x12]] }
  0x1e   :  { %v302_v41 = vmul.f32 %v301_v39, %v208_v23  ;;  %v285_v42 = vmul.f32 %v283_v34, %v209_v25  ;;  %v359_v44 = vstv %s515_s8  ;;  %v341_v46 = vstv %s514_s9  ;;  %s690_s15 = sld [smem:[#allocation3 + $0x9]] }
  0x1f   :  { %v360_v47 = vmul.f32 %v359_v44, %v338_v43  ;;  %v343_v48 = vmul.f32 %v341_v46, %v339_v45  ;;  %v342_v49 = vmul.f32 %v341_v46, %v338_v43  ;;  %v377_v50 = vstv %s516_s10  ;;  %s694_s16 = sld [smem:[#allocation6 + $0x2]] }
  0x20   :  { %v379_v51 = vmul.f32 %v377_v50, %v339_v45  ;;  %v378_v52 = vmul.f32 %v377_v50, %v338_v43  ;;  %v361_v53 = vmul.f32 %v359_v44, %v339_v45  ;;  %v413_v54 = vstv %s518_s11  ;;  %s58_s17 = sld [smem:[#allocation3]] }
  0x21   :  { %123 = vrot.lane.b32.xlu2 %v118_v11, %s585_s25  ;;  %105 = vrot.lane.b32.xlu1 %v100_v12, %s585_s25  ;;  %v395_v55 = vstv %s517_s12  ;;  %v414_v56 = vmul.f32 %v413_v54, %v338_v43  ;;  %v415_v62 = vmul.f32 %v413_v54, %v339_v45  ;;  %s696_s18 = sld [smem:[#allocation6 + $0x1]] }
  0x22   :  { %86 = vrot.lane.b32.xlu0 %v81_v13, %s585_s25  ;;  %v397_v57 = vmul.f32 %v395_v55, %v339_v45  ;;  %v396_v58 = vmul.f32 %v395_v55, %v338_v43  ;;  %v431_v59 = vstv %s519_s13  ;;  %s698_s19 = sld [smem:[#allocation6]] }
  0x23   :  { %v433_v60 = vmul.f32 %v431_v59, %v339_v45  ;;  %v432_v61 = vmul.f32 %v431_v59, %v338_v43  ;;  %v71_v19 = vstv %s495_s14  ;;  %s700_s20 = sld [smem:[#allocation3 + $0xc]] }
  0x24   :  { %v65_v23 = vstv %s690_s15  ;;  %s710_s1 = sld [smem:[#allocation3 + $0x15]] }
  0x25   :  { %s712_s21 = sld [smem:[#allocation3 + $0x3]] }
  0x26   :  { %s715_s2 = sld [smem:[#allocation3 + $0xf]] }
  0x27   :  { %s726_s22 = sld [smem:[#allocation3 + $0x18]] }
  0x28   :  { %s761_s23 = sld [smem:[#allocation3 + $0x6]] }
  0x29   :  { %158 = vrot.lane.b32.xlu2 %v154_v16, %s586_s28  ;;  %141 = vrot.lane.b32.xlu1 %v136_v17, %s586_s28  ;;  %v197_v39 = vstv %s700_s20 }
  0x2a   :  { %139 = vrot.lane.b32.xlu0 %v135_v18, %s586_s28 }
  0x31   :  { %178 = vrot.lane.b32.xlu2 %v173_v20, %s586_s28  ;;  %176 = vrot.lane.b32.xlu1 %v172_v21, %s586_s28  ;;  %v56_v20 = vld [vmem:[#allocation2] sm:$0x1] }
  0x32   :  { %160 = vrot.lane.b32.xlu0 %v155_v22, %s586_s28  ;;  %v57_v22 = vld [vmem:[#allocation2 + $0x8] sm:$0x1]  ;;  %v72_v25 = vmul.f32 %v71_v19, %v56_v20 }
  0x33   :  { %v73_v30 = vmul.f32 %v71_v19, %v57_v22 }
  0x39   :  { %234 = vrot.lane.b32.xlu2 %v230_v27, %s585_s25  ;;  %218 = vrot.lane.b32.xlu1 %v213_v28, %s585_s25  ;;  %v55_v27 = vstv %s694_s16  ;;  %v59_v28 = vstv %s58_s17 }
  0x3a   :  { %216 = vrot.lane.b32.xlu0 %v212_v29, %s585_s25  ;;  %v74_v35 = vadd.f32 %v72_v25, %v55_v27  ;;  %v75_v43 = vadd.f32 %v73_v30, %v55_v27 }
  0x41   :  { %254 = vrot.lane.b32.xlu2 %v249_v31, %s585_s25  ;;  %252 = vrot.lane.b32.xlu1 %v248_v32, %s585_s25  ;;  %v66_v31 = vmul.f32 %v65_v23, %v56_v20 }
  0x42   :  { %236 = vrot.lane.b32.xlu0 %v231_v33, %s585_s25  ;;  %v53_v33 = vstv %s696_s18 }
  0x43   :  { %v68_v44 = vadd.f32 %v66_v31, %v53_v33 }
  0x49   :  { %288 = vrot.lane.b32.xlu2 %v284_v36, %s586_s28  ;;  %272 = vrot.lane.b32.xlu1 %v267_v37, %s586_s28  ;;  %v60_v36 = vmul.f32 %v59_v28, %v56_v20  ;;  %v51_v37 = vstv %s698_s19  ;;  %v745_v20 = vld [vmem:[#allocation2 + $0x2] sm:$0x1] }
  0x4a   :  { %270 = vrot.lane.b32.xlu0 %v266_v38, %s586_s28  ;;  %v188_v38 = vld [vmem:[#allocation2 + $0x1] sm:$0x1] }
  0x51   :  { %308 = vrot.lane.b32.xlu2 %v303_v40, %s586_s28  ;;  %306 = vrot.lane.b32.xlu1 %v302_v41, %s586_s28  ;;  %v67_v40 = vmul.f32 %v65_v23, %v57_v22  ;;  %v61_v41 = vmul.f32 %v59_v28, %v57_v22  ;;  %v327_v22 = vstv %s715_s2 }
  0x52   :  { %290 = vrot.lane.b32.xlu0 %v285_v42, %s586_s28 }
  0x53   :  { %v69_v55 = vadd.f32 %v67_v40, %v53_v33 }
  0x59   :  { %364 = vrot.lane.b32.xlu2 %v360_v47, %s585_s25  ;;  %348 = vrot.lane.b32.xlu1 %v343_v48, %s585_s25 }
  0x5a   :  { %346 = vrot.lane.b32.xlu0 %v342_v49, %s585_s25 }
  0x61   :  { %384 = vrot.lane.b32.xlu2 %v379_v51, %s585_s25  ;;  %382 = vrot.lane.b32.xlu1 %v378_v52, %s585_s25  ;;  %v62_v51 = vadd.f32 %v60_v36, %v51_v37 }
  0x62   :  { %366 = vrot.lane.b32.xlu0 %v361_v53, %s585_s25  ;;  %v198_v53 = vmul.f32 %v197_v39, %v188_v38  ;;  %s476_s25 = sshll.u32 %s587_s24, 4  ;;  %s477_s25 = int_to_ptr.vmem [resolvable:$true] %s476_s25 }
  0x69   :  { %418 = vrot.lane.b32.xlu2 %v414_v56, %s586_s28  ;;  %402 = vrot.lane.b32.xlu1 %v397_v57, %s586_s28  ;;  %v63_v56 = vadd.f32 %v61_v41, %v51_v37  ;;  %v333_v37 = vstv %s726_s22 }
  0x6a   :  { %400 = vrot.lane.b32.xlu0 %v396_v58, %s586_s28 }
  0x71   :  { %438 = vrot.lane.b32.xlu2 %v433_v60, %s586_s28  ;;  %436 = vrot.lane.b32.xlu1 %v432_v61, %s586_s28  ;;  %v189_v60 = vld [vmem:[#allocation2 + $0x9] sm:$0x1]  ;;  %v203_v61 = vstv %s710_s1 }
  0x72   :  { %420 = vrot.lane.b32.xlu0 %v415_v62, %s586_s28  ;;  %v191_v62 = vstv %s712_s21  ;;  %s588_s28 = smov 32  }
  0x73   :  { %v122_v63 = vpop.permute.xlu2 %121  ;;  %v193_v30 = vmul.f32 %v191_v62, %v189_v60  ;;  %v192_v33 = vmul.f32 %v191_v62, %v188_v38 }
  0x74   :  { %v125_v29 = vrot.slane %v122_v63, 4 }
  0x76   :  { %v127_v42 = vsel %vm90_vm4, %v122_v63, %v125_v29  ;;  %v205_v29 = vmul.f32 %v203_v61, %v189_v60 }
  0x77   :  { %v733_v54 = vadd.f32 %v127_v42, %v74_v35 }
  0x7b   :  { %v124_v0 = vpop.permute.xlu2 %123 }
  0x7c   :  { %v126_v32 = vrot.slane %v124_v0, 4 }
  0x7e   :  { %v128_v46 = vsel %vm90_vm4, %v124_v0, %v126_v32 }
  0x7f   :  { %v132_v58 = vadd.f32 %v128_v46, %v75_v43  ;;  %v776_v46 = vld [vmem:[#allocation2 + $0xa] sm:$0x1] }
  0x83   :  { %v658_v1 = vpop.permute.xlu2 %158 }
  0x84   :  { %v162_v47 = vrot.slane %v658_v1, 4 }
  0x86   :  { %v164_v0 = vsel %vm145_vm5, %v658_v1, %v162_v47 }
  0x8b   :  { %v660_v2 = vpop.permute.xlu2 %178  ;;  %v104_v3 = vpop.permute.xlu1 %103 }
  0x8c   :  { %v662_v4 = vpop.permute.xlu0 %84  ;;  %v107_v34 = vrot.slane %v104_v3, 4  ;;  %v181_v48 = vrot.slane %v660_v2, 4 }
  0x8d   :  { %v88_v52 = vrot.slane %v662_v4, 4 }
  0x8e   :  { %v109_v49 = vsel %vm90_vm4, %v104_v3, %v107_v34  ;;  %v183_v3 = vsel %vm145_vm5, %v660_v2, %v181_v48 }
  0x8f   :  { %v113_v59 = vadd.f32 %v109_v49, %v68_v44  ;;  %v91_v23 = vsel %vm90_vm4, %v662_v4, %v88_v52  ;;  %v187_v31 = vadd.f32 %v183_v3, %v132_v58  ;;  %v759_v4 = vmul.f32 %v327_v22, %v745_v20 }
  0x90   :  { %v95_v35 = vadd.f32 %v91_v23, %v62_v51  ;;  %v321_v23 = vstv %s761_s23 }
  0x91   :  { %v168_v32 = vadd.f32 %v164_v0, %v113_v59 }
  0x93   :  { %v664_v5 = vpop.permute.xlu1 %105  ;;  %v668_v7 = vpop.permute.xlu2 %234  ;;  %v200_v49 = vadd.f32 %v198_v53, %v168_v32  ;;  %v323_v32 = vmul.f32 %v321_v23, %v776_v46 }
  0x94   :  { %v666_v6 = vpop.permute.xlu0 %86  ;;  %v238_v25 = vrot.slane %v668_v7, 4  ;;  %v108_v27 = vrot.slane %v664_v5, 4 }
  0x95   :  { %v89_v57 = vrot.slane %v666_v6, 4 }
  0x96   :  { %v240_v41 = vsel %vm90_vm4, %v668_v7, %v238_v25  ;;  %v110_v42 = vsel %vm90_vm4, %v664_v5, %v108_v27  ;;  %v207_v7 = vadd.f32 %v205_v29, %v187_v31 }
  0x97   :  { %v92_v1 = vsel %vm90_vm4, %v666_v6, %v89_v57  ;;  %v204_v6 = vmul.f32 %v203_v61, %v188_v38  ;;  %v244_v57 = vadd.f32 %v240_v41, %v200_v49  ;;  %v114_v58 = vadd.f32 %v110_v42, %v69_v55 }
  0x98   :  { %v96_v43 = vadd.f32 %v92_v1, %v63_v56  ;;  %v787_v56 = vmul.f32 %v333_v37, %v776_v46  ;;  %v334_v49 = vmul.f32 %v333_v37, %v745_v20 }
  0x9b   :  { %v670_v8 = vpop.permute.xlu1 %141  ;;  %v674_v10 = vpop.permute.xlu2 %254 }
  0x9c   :  { %v672_v9 = vpop.permute.xlu0 %139  ;;  %v144_v19 = vrot.slane %v670_v8, 4  ;;  %v257_v2 = vrot.slane %v674_v10, 4 }
  0x9d   :  { %v143_v28 = vrot.slane %v672_v9, 4 }
  0x9e   :  { %v147_v36 = vsel %vm145_vm5, %v670_v8, %v144_v19  ;;  %v259_v8 = vsel %vm90_vm4, %v674_v10, %v257_v2 }
  0x9f   :  { %v146_v44 = vsel %vm145_vm5, %v672_v9, %v143_v28  ;;  %v151_v51 = vadd.f32 %v147_v36, %v96_v43  ;;  %v199_v9 = vmul.f32 %v197_v39, %v189_v60  ;;  %v263_v59 = vadd.f32 %v259_v8, %v207_v7 }
  0xa0   :  { %v150_v52 = vadd.f32 %v146_v44, %v95_v35  ;;  %v322_v36 = vmul.f32 %v321_v23, %v745_v20 }
  0xa1   :  { %v195_v19 = vadd.f32 %v193_v30, %v151_v51 }
  0xa2   :  { %v194_v27 = vadd.f32 %v192_v33, %v150_v52 }
  0xa3   :  { %v676_v11 = vpop.permute.xlu1 %176  ;;  %v680_v13 = vpop.permute.xlu2 %288 }
  0xa4   :  { %v678_v12 = vpop.permute.xlu0 %160  ;;  %v180_v38 = vrot.slane %v676_v11, 4  ;;  %v292_v53 = vrot.slane %v680_v13, 4 }
  0xa5   :  { %v163_v47 = vrot.slane %v678_v12, 4 }
  0xa6   :  { %v182_v0 = vsel %vm145_vm5, %v676_v11, %v180_v38  ;;  %v294_v30 = vsel %vm145_vm5, %v680_v13, %v292_v53 }
  0xa7   :  { %v165_v39 = vsel %vm145_vm5, %v678_v12, %v163_v47  ;;  %v298_v43 = vadd.f32 %v294_v30, %v244_v57 }
  0xa8   :  { %v169_v29 = vadd.f32 %v165_v39, %v114_v58 }
  0xaa   :  { %v201_v8 = vadd.f32 %v199_v9, %v169_v29 }
  0xab   :  { %v682_v14 = vpop.permute.xlu1 %218  ;;  %v686_v16 = vpop.permute.xlu2 %308 }
  0xac   :  { %v684_v15 = vpop.permute.xlu0 %216  ;;  %v221_v48 = vrot.slane %v682_v14, 4  ;;  %v311_v3 = vrot.slane %v686_v16, 4 }
  0xad   :  { %v220_v5 = vrot.slane %v684_v15, 4 }
  0xae   :  { %v223_v60 = vsel %vm90_vm4, %v682_v14, %v221_v48  ;;  %v186_v14 = vadd.f32 %v182_v0, %v733_v54 }
  0xaf   :  { %v222_v55 = vsel %vm90_vm4, %v684_v15, %v220_v5  ;;  %v227_v2 = vadd.f32 %v223_v60, %v195_v19 }
  0xb0   :  { %v226_v31 = vadd.f32 %v222_v55, %v194_v27  ;;  %v206_v44 = vadd.f32 %v204_v6, %v186_v14 }
  0xb3   :  { %v688_v17 = vpop.permute.xlu1 %252  ;;  %v707_v26 = vpop.permute.xlu2 %364 }
  0xb4   :  { %v692_v18 = vpop.permute.xlu0 %236  ;;  %v256_v28 = vrot.slane %v688_v17, 4  ;;  %v368_v47 = vrot.slane %v707_v26, 4 }
  0xb5   :  { %v239_v11 = vrot.slane %v692_v18, 4 }
  0xb6   :  { %v258_v41 = vsel %vm90_vm4, %v688_v17, %v256_v28  ;;  %v370_v27 = vsel %vm90_vm4, %v707_v26, %v368_v47 }
  0xb7   :  { %v262_v17 = vadd.f32 %v258_v41, %v206_v44 }
  0xbb   :  { %v702_v21 = vpop.permute.xlu1 %272  ;;  %v738_v63 = vpop.permute.xlu2 %384 }
  0xbc   :  { %v705_v24 = vpop.permute.xlu0 %270  ;;  %v275_v10 = vrot.slane %v702_v21, 4  ;;  %v387_v6 = vrot.slane %v738_v63, 4 }
  0xbd   :  { %v274_v61 = vrot.slane %v705_v24, 4 }
  0xbe   :  { %v277_v12 = vsel %vm145_vm5, %v702_v21, %v275_v10  ;;  %v313_v21 = vsel %vm145_vm5, %v686_v16, %v311_v3  ;;  %v389_v19 = vsel %vm90_vm4, %v738_v63, %v387_v6 }
  0xbf   :  { %v276_v15 = vsel %vm145_vm5, %v705_v24, %v274_v61  ;;  %v281_v35 = vadd.f32 %v277_v12, %v227_v2  ;;  %v241_v24 = vsel %vm90_vm4, %v692_v18, %v239_v11  ;;  %v317_v16 = vadd.f32 %v313_v21, %v263_v59 }
  0xc0   :  { %v280_v13 = vadd.f32 %v276_v15, %v226_v31  ;;  %v245_v7 = vadd.f32 %v241_v24, %v201_v8  ;;  %v330_v12 = vadd.f32 %v759_v4, %v298_v43 }
  0xc1   :  { %v325_v18 = vadd.f32 %v323_v32, %v281_v35  ;;  %v337_v28 = vadd.f32 %v787_v56, %v317_v16 }
  0xc2   :  { %v324_v10 = vadd.f32 %v322_v36, %v280_v13  ;;  %v374_v56 = vadd.f32 %v370_v27, %v330_v12 }
  0xc3   :  { %v720_v45 = vpop.permute.xlu1 %306  ;;  %v791_v62 = vpop.permute.xlu2 %418  ;;  %v393_v2 = vadd.f32 %v389_v19, %v337_v28 }
  0xc4   :  { %v728_v50 = vpop.permute.xlu0 %290  ;;  %v310_v42 = vrot.slane %v720_v45, 4 }
  0xc5   :  { %v293_v38 = vrot.slane %v728_v50, 4 }
  0xc6   :  { %v312_v9 = vsel %vm145_vm5, %v720_v45, %v310_v42 }
  0xc7   :  { %v295_v20 = vsel %vm145_vm5, %v728_v50, %v293_v38  ;;  %v316_v39 = vadd.f32 %v312_v9, %v262_v17  ;;  %v329_v50 = vmul.f32 %v327_v22, %v776_v46 }
  0xc8   :  { %v299_v55 = vadd.f32 %v295_v20, %v245_v7 }
  0xc9   :  { %v336_v46 = vadd.f32 %v334_v49, %v316_v39 }
  0xca   :  { %v331_v30 = vadd.f32 %v329_v50, %v299_v55 }
  0xcb   :  { %v763_v34 = vpop.permute.xlu1 %348  ;;  %v439_v51 = vpop.permute.xlu2 %438 }
  0xcc   :  { %v768_v40 = vpop.permute.xlu0 %346  ;;  %v351_v33 = vrot.slane %v763_v34, 4  ;;  %v441_v61 = vrot.slane %v439_v51, 4 }
  0xcd   :  { %v350_v54 = vrot.slane %v768_v40, 4 }
  0xce   :  { %v353_v48 = vsel %vm90_vm4, %v763_v34, %v351_v33  ;;  %v422_v34 = vrot.slane %v791_v62, 4  ;;  %v443_v14 = vsel %vm145_vm5, %v439_v51, %v441_v61 }
  0xcf   :  { %v352_v5 = vsel %vm90_vm4, %v768_v40, %v350_v54  ;;  %v357_v37 = vadd.f32 %v353_v48, %v325_v18  ;;  %v447_v33 = vadd.f32 %v443_v14, %v393_v2 }
  0xd0   :  { %v356_v53 = vadd.f32 %v352_v5, %v324_v10  ;;  %v424_v22 = vsel %vm145_vm5, %v791_v62, %v422_v34 }
  0xd1   :  { %v428_v35 = vadd.f32 %v424_v22, %v374_v56  ;;  %v467_v24 = vperm.slane %v447_v33, 0 }
  0xd3   :  { %v804_v25 = vpop.permute.xlu1 %382  ;;  %v458_v42 = vperm.slane %v428_v35, 0 }
  0xd4   :  { %v810_v1 = vpop.permute.xlu0 %366  ;;  %v386_v40 = vrot.slane %v804_v25, 4 }
  0xd5   :  { %v369_v45 = vrot.slane %v810_v1, 4 }
  0xd6   :  { %v388_v29 = vsel %vm90_vm4, %v804_v25, %v386_v40 }
  0xd7   :  { %v371_v26 = vsel %vm90_vm4, %v810_v1, %v369_v45  ;;  %v392_v21 = vadd.f32 %v388_v29, %v336_v46 }
  0xd8   :  { %v375_v36 = vadd.f32 %v371_v26, %v331_v30 }
  0xdb   :  { %v403_v52 = vpop.permute.xlu1 %402 }
  0xdc   :  { %v405_v57 = vrot.slane %v403_v52, 4  ;;  %v401_v58 = vpop.permute.xlu0 %400 }
  0xdd   :  { %v404_v59 = vrot.slane %v401_v58, 4 }
  0xde   :  { %v407_v0 = vsel %vm145_vm5, %v403_v52, %v405_v57 }
  0xdf   :  { %v411_v60 = vadd.f32 %v407_v0, %v357_v37  ;;  %v406_v3 = vsel %vm145_vm5, %v401_v58, %v404_v59 }
  0xe0   :  { %v410_v23 = vadd.f32 %v406_v3, %v356_v53 }
  0xe1   :  { %v451_v11 = vperm.slane %v411_v60, 0 }
  0xe2   :  { %v450_v63 = vperm.slane %v410_v23, 0 }
  0xe3   :  { %v437_v15 = vpop.permute.xlu1 %436 }
  0xe4   :  { %v453_v31 = vsel %vm452_vm6, %v451_v11, %v450_v63  ;;  %v440_v4 = vrot.slane %v437_v15, 4  ;;  %v421_v32 = vpop.permute.xlu0 %420 }
  0xe5   :  { %455 = vst [vmem:[#allocation8] sm:$0x3] %v453_v31  ;;  %v423_v25 = vrot.slane %v421_v32, 4 }
  0xe6   :  { %v442_v54 = vsel %vm145_vm5, %v437_v15, %v440_v4 }
  0xe7   :  { %v446_v62 = vadd.f32 %v442_v54, %v392_v21  ;;  %v425_v41 = vsel %vm145_vm5, %v421_v32, %v423_v25 }
  0xe8   :  { %v429_v1 = vadd.f32 %v425_v41, %v375_v36 }
  0xe9   :  { %v466_v13 = vperm.slane %v446_v62, 0 }
  0xea   :  { %v459_v43 = vperm.slane %v429_v1, 0 }
  0xeb   :  { %v468_v44 = vsel %vm452_vm6, %v467_v24, %v466_v13 }
  0xec   :  { %471 = vst [vmem:[#allocation8 + $0x4] sm:$0x3] %v468_v44  ;;  %v460_v8 = vsel %vm452_vm6, %v459_v43, %v458_v42 }
  0xed   :  { %463 = vst [vmem:[#allocation8 + $0x2] sm:$0x3] %v460_v8 }
  0xee   :  { %484 = dma.vmem_to_hbm [thread:$0]  %s477_s25, 96, %s479_s27, [#allocation4], %s588_s28, %s588_s28, %s589_s29  }
  0xef   :  { %580 = dma.done.wait [#allocation4], 96  }
  0xf0   :  { %581 = vsyncadd [#allocation4], 4294967200 }
  0xf1   :  { %489 = vsyncpa [#allocation4], 1 }
  0xf2   :  { %490 = vsyncpa [#allocation5], 1 }
  0xf3   :  { %491 = vsyncpa [#allocation7], 1 }

</bundles_post_ra>
